<compile_context>
chip_gen: v7x
topology: tpu7x:2x2x1
jax: 0.10.0
libtpu: 0.0.40
codegen_flags: <defaults>
</compile_context>

<pallas_src>
import functools
import numpy as np
import jax
import jax.numpy as jnp
from jax import lax
from jax.experimental import pallas as pl
from jax.experimental.pallas import tpu as pltpu

_LINEAR_SCALE = 1.0   # deterministic "parameter" of the static (linear) kernel


# ----------------------------------------------------------------------------
# Pallas kernel: fused Goursat PDE solves for (X,X), (Y,Y), (X,Y) per batch tile
# ----------------------------------------------------------------------------
def _sig_pde_kernel(xr_ref, yr_ref, xc_ref, yc_ref,
                    oxx_ref, oyy_ref, oxy_ref,
                    *, n_chan, ta, width, mx, my, naive_solver):
    """One batch tile.

    xr_ref: (mx, ta, n_chan)    row-side increments of X (time-major)
    yr_ref: (my, ta, n_chan)    row-side increments of Y
    xc_ref: (n_chan, ta, width) col-side increments of X; lane j holds
                                dX[:, j-1, :] (lane 0 and lanes > mx are 0)
    yc_ref: (n_chan, ta, width) col-side increments of Y (same convention)
    o*_ref: (ta, width)         last PDE row; the solution sits at lane mx/my.
    """
    lane = lax.broadcasted_iota(jnp.int32, (ta, width), 1)  # hoisted iota

    def solve(row_ref, col_ref, n_rows, n_cols, out_ref):
        def body(i, k):
            # increment row i:  inc[:, j] = <d_row[i], d_col[j-1]>  (0 at j=0)
            row = row_ref[i]                              # (ta, n_chan)
            inc = row[:, 0:1] * col_ref[0]                # (ta, width)
            for d in range(1, n_chan):
                inc = inc + row[:, d:d + 1] * col_ref[d]

            k_m1 = pltpu.roll(k, 1, 1)                    # K[i, j-1]
            if naive_solver:
                # K[i+1,j+1] = K[i+1,j] + (K[i,j+1] + K[i,j]*(inc-1))
                b = k + k_m1 * (inc - 1.0)
                b = jnp.where(lane == 0, 1.0, b)          # boundary K[:, 0]=1
                off = 1
                while off < n_cols:                       # inclusive cumsum
                    b = b + jnp.where(lane >= off,
                                      pltpu.roll(b, off, 1), 0.0)
                    off *= 2
                return b
            else:
                # K[i+1,j+1] = c1*K[i+1,j] + (c1*K[i,j+1] - c2*K[i,j])
                q = inc * inc * (1.0 / 12.0)
                c1 = 1.0 + 0.5 * inc + q
                c2 = 1.0 - q
                a = jnp.where(lane == 0, 0.0, c1)         # lane 0: f0(x) = 1
                b = jnp.where(lane == 0, 1.0, c1 * k - c2 * k_m1)
                off = 1
                while off < n_cols:                       # affine H-S scan
                    a_sh = jnp.where(lane >= off, pltpu.roll(a, off, 1), 1.0)
                    b_sh = jnp.where(lane >= off, pltpu.roll(b, off, 1), 0.0)
                    b = a * b_sh + b
                    a = a * a_sh
                    off *= 2
                return b

        k0 = jnp.ones((ta, width), jnp.float32)           # K[0, :] = 1
        out_ref[...] = lax.fori_loop(0, n_rows, body, k0)

    solve(xr_ref, xc_ref, mx, mx + 1, oxx_ref)
    solve(yr_ref, yc_ref, my, my + 1, oyy_ref)
    solve(xr_ref, yc_ref, mx, my + 1, oxy_ref)


# ----------------------------------------------------------------------------
# Wrappers (layout plumbing + pallas_call)
# ----------------------------------------------------------------------------
def sig_kernels_fused(X, Y, dyadic_order=0, naive_solver=False, batch_tile=8):
    """Returns (k_XX, k_YY, k_XY), each of shape (A,), from one pallas_call."""
    X = jnp.asarray(X, jnp.float32)
    Y = jnp.asarray(Y, jnp.float32)
    A, M, D = X.shape
    A2, N, D2 = Y.shape
    assert A == A2 and D == D2 and M >= 2 and N >= 2

    f = 2 ** dyadic_order
    mx, my = f * (M - 1), f * (N - 1)
    width = ((max(mx, my) + 1 + 127) // 128) * 128        # lane-dense, x128
    ta = max(8, ((batch_tile + 7) // 8) * 8)              # sublane multiple
    a_pad = ((A + ta - 1) // ta) * ta

    # exact dyadic refinement for a linear static kernel: repeat (dX/f) f times
    # TODO(synk): a general user-supplied static_kernel (e.g. RBF) would need
    # the full Gram + tile() path instead of increment inner products.
    dX = (X[:, 1:, :] - X[:, :-1, :]) * (_LINEAR_SCALE / f)
    dY = (Y[:, 1:, :] - Y[:, :-1, :]) * (1.0 / f)
    if f > 1:
        dX = jnp.repeat(dX, f, axis=1)
        dY = jnp.repeat(dY, f, axis=1)
    dX = jnp.pad(dX, ((0, a_pad - A), (0, 0), (0, 0)))
    dY = jnp.pad(dY, ((0, a_pad - A), (0, 0), (0, 0)))

    # layout plumbing (HBM-side transposes): row-side (time, batch, chan) and
    # col-side (chan, batch, lane-padded time+1) views of the increments.
    xr = jnp.transpose(dX, (1, 0, 2))                                  # (mx, A, D)
    yr = jnp.transpose(dY, (1, 0, 2))                                  # (my, A, D)
    xc = jnp.pad(jnp.transpose(dX, (2, 0, 1)),
                 ((0, 0), (0, 0), (1, width - mx - 1)))                # (D, A, width)
    yc = jnp.pad(jnp.transpose(dY, (2, 0, 1)),
                 ((0, 0), (0, 0), (1, width - my - 1)))                # (D, A, width)

    kernel = functools.partial(_sig_pde_kernel, n_chan=D, ta=ta, width=width,
                               mx=mx, my=my, naive_solver=naive_solver)
    out_sds = jax.ShapeDtypeStruct((a_pad, width), jnp.float32)
    oxx, oyy, oxy = pl.pallas_call(
        kernel,
        grid=(a_pad // ta,),
        in_specs=[
            pl.BlockSpec((mx, ta, D), lambda b: (0, b, 0)),
            pl.BlockSpec((my, ta, D), lambda b: (0, b, 0)),
            pl.BlockSpec((D, ta, width), lambda b: (0, b, 0)),
            pl.BlockSpec((D, ta, width), lambda b: (0, b, 0)),
        ],
        out_specs=[
            pl.BlockSpec((ta, width), lambda b: (b, 0)),
            pl.BlockSpec((ta, width), lambda b: (b, 0)),
            pl.BlockSpec((ta, width), lambda b: (b, 0)),
        ],
        out_shape=[out_sds, out_sds, out_sds],
        compiler_params=pltpu.CompilerParams(
            dimension_semantics=("parallel",),
            vmem_limit_bytes=48 * 1024 * 1024),
    )(xr, yr, xc, yc)
    return oxx[:A, mx], oyy[:A, my], oxy[:A, my]


def sig_loss_naive(X, Y, dyadic_order=0, naive_solver=False, batch_tile=8):
    kxx, kyy, kxy = sig_kernels_fused(X, Y, dyadic_order, naive_solver,
                                      batch_tile)
    return jnp.mean(kxx) + jnp.mean(kyy) - 2.0 * jnp.mean(kxy)


# ----------------------------------------------------------------------------
# Pure-numpy reference (mirrors the PyTorch code exactly) for verification
# ----------------------------------------------------------------------------
def _ref_sig_kernel(X, Y, dyadic_order=0, naive_solver=False):
    X = np.asarray(X, np.float64)
    Y = np.asarray(Y, np.float64)
    A, M, _ = X.shape
    N = Y.shape[1]
    f = 2 ** dyadic_order
    MM, NN = f * (M - 1), f * (N - 1)
    G = _LINEAR_SCALE * np.einsum('amd,and->amn', X, Y)
    Ginc = G[:, 1:, 1:] + G[:, :-1, :-1] - G[:, 1:, :-1] - G[:, :-1, 1:]
    Ginc = np.repeat(np.repeat(Ginc, f, axis=1), f, axis=2) / float(f * f)
    K = np.zeros((A, MM + 1, NN + 1))
    K[:, 0, :] = 1.0
    K[:, :, 0] = 1.0
    for i in range(MM):
        for j in range(NN):
            inc = Ginc[:, i, j]
            k10, k01, k00 = K[:, i + 1, j], K[:, i, j + 1], K[:, i, j]
            if naive_solver:
                K[:, i + 1, j + 1] = k10 + k01 + k00 * (inc - 1.0)
            else:
                K[:, i + 1, j + 1] = ((k10 + k01) * (1.0 + 0.5 * inc + inc * inc / 12.0)
                                      - k00 * (1.0 - inc * inc / 12.0))
    return K[:, -1, -1]


def _ref_sig_loss(X, Y, dyadic_order=0, naive_solver=False):
    return (_ref_sig_kernel(X, X, dyadic_order, naive_solver).mean()
            + _ref_sig_kernel(Y, Y, dyadic_order, naive_solver).mean()
            - 2.0 * _ref_sig_kernel(X, Y, dyadic_order, naive_solver).mean())


if __name__ == "__main__":
    key = jax.random.PRNGKey(0)
    kx, ky, kz = jax.random.split(key, 3)

    # config 1: batch=2, seq=8, channels=4, implicit (non-naive) solver, order 0
    A, L, D = 2, 8, 4
    X = 0.5 * jax.random.normal(kx, (A, L, D), dtype=jnp.float32)
    Y = 0.5 * jax.random.normal(ky, (A, L, D), dtype=jnp.float32)

    kxx, kyy, kxy = [np.asarray(jax.block_until_ready(v))
                     for v in sig_kernels_fused(X, Y, 0, False)]
    loss = float(np.mean(kxx) + np.mean(kyy) - 2.0 * np.mean(kxy))

    Xn, Yn = np.asarray(X), np.asarray(Y)
    rxx = _ref_sig_kernel(Xn, Xn, 0, False)
    ryy = _ref_sig_kernel(Yn, Yn, 0, False)
    rxy = _ref_sig_kernel(Xn, Yn, 0, False)
    rloss = float(rxx.mean() + ryy.mean() - 2.0 * rxy.mean())
    ok = (np.allclose(kxx, rxx, rtol=1e-3, atol=1e-4)
          and np.allclose(kyy, ryy, rtol=1e-3, atol=1e-4)
          and np.allclose(kxy, rxy, rtol=1e-3, atol=1e-4)
          and np.allclose(loss, rloss, rtol=1e-3, atol=1e-3))
    if not ok:
        raise SystemExit(f"mismatch cfg1: pallas={loss} ref={rloss}")

    # config 2: different lengths, dyadic_order=1, explicit (naive) solver
    X2 = 0.5 * jax.random.normal(kz, (A, L, D), dtype=jnp.float32)
    Y2 = Y[:, :6, :]
    loss2 = float(jax.block_until_ready(
        sig_loss_naive(X2, Y2, dyadic_order=1, naive_solver=True)))
    rloss2 = float(_ref_sig_loss(np.asarray(X2), np.asarray(Y2), 1, True))
    if not np.allclose(loss2, rloss2, rtol=1e-3, atol=1e-3):
        raise SystemExit(f"mismatch cfg2: pallas={loss2} ref={rloss2}")

    print("KERNEL_OK")
</pallas_src>

<mosaic_0001>
module attributes {stable_mosaic.version = 11 : i64} {
  func.func @_sig_pde_kernel(%arg0: i32, %arg1: memref<7x8x4xf32, #tpu.memory_space<vmem>>, %arg2: memref<7x8x4xf32, #tpu.memory_space<vmem>>, %arg3: memref<4x8x128xf32, #tpu.memory_space<vmem>>, %arg4: memref<4x8x128xf32, #tpu.memory_space<vmem>>, %arg5: memref<8x128xf32, #tpu.memory_space<vmem>>, %arg6: memref<8x128xf32, #tpu.memory_space<vmem>>, %arg7: memref<8x128xf32, #tpu.memory_space<vmem>>) attributes {dimension_semantics = [#tpu.dimension_semantics<parallel>], iteration_bounds = array<i64: 1>, scalar_prefetch = 0 : i64, scratch_operands = 0 : i64, tpu.core_type = #tpu.core_type<tc>, window_params = [{transform_indices = @transform_0, window_bounds = array<i64: 7, 8, 4>}, {transform_indices = @transform_1, window_bounds = array<i64: 7, 8, 4>}, {transform_indices = @transform_2, window_bounds = array<i64: 4, 8, 128>}, {transform_indices = @transform_3, window_bounds = array<i64: 4, 8, 128>}, {transform_indices = @transform_4, window_bounds = array<i64: 8, 128>}, {transform_indices = @transform_5, window_bounds = array<i64: 8, 128>}, {transform_indices = @transform_6, window_bounds = array<i64: 8, 128>}]} {
    %0 = tpu.iota {dimensions = array<i32: 1>} : vector<8x128xi32>
    %cst = arith.constant 1.000000e+00 : f32
    %1 = vector.broadcast %cst : f32 to vector<8x128xf32>
    %c0_i32 = arith.constant 0 : i32
    %c7_i32 = arith.constant 7 : i32
    %2 = arith.addi %c0_i32, %c7_i32 : i32
    %c1_i32 = arith.constant 1 : i32
    %3 = scf.for %arg8 = %c0_i32 to %2 step %c1_i32 iter_args(%arg9 = %1) -> (vector<8x128xf32>)  : i32 {
      %13 = arith.index_cast %arg8 : i32 to index
      %c0_16 = arith.constant 0 : index
      %c0_17 = arith.constant 0 : index
      %14 = vector.load %arg1[%13, %c0_16, %c0_17] : memref<7x8x4xf32, #tpu.memory_space<vmem>>, vector<1x8x4xf32>
      %15 = vector.shape_cast %14 : vector<1x8x4xf32> to vector<8x4xf32>
      %16 = vector.extract_strided_slice %15 {offsets = [0, 0], sizes = [8, 1], strides = [1, 1]} : vector<8x4xf32> to vector<8x1xf32>
      %c0_18 = arith.constant 0 : index
      %c0_19 = arith.constant 0 : index
      %c0_20 = arith.constant 0 : index
      %17 = vector.load %arg3[%c0_18, %c0_19, %c0_20] : memref<4x8x128xf32, #tpu.memory_space<vmem>>, vector<1x8x128xf32>
      %18 = vector.shape_cast %17 : vector<1x8x128xf32> to vector<8x128xf32>
      %19 = vector.broadcast %16 : vector<8x1xf32> to vector<8x128xf32>
      %20 = arith.mulf %19, %18 : vector<8x128xf32>
      %21 = vector.extract_strided_slice %15 {offsets = [0, 1], sizes = [8, 1], strides = [1, 1]} : vector<8x4xf32> to vector<8x1xf32>
      %c1 = arith.constant 1 : index
      %c0_21 = arith.constant 0 : index
      %c0_22 = arith.constant 0 : index
      %22 = vector.load %arg3[%c1, %c0_21, %c0_22] : memref<4x8x128xf32, #tpu.memory_space<vmem>>, vector<1x8x128xf32>
      %23 = vector.shape_cast %22 : vector<1x8x128xf32> to vector<8x128xf32>
      %24 = vector.broadcast %21 : vector<8x1xf32> to vector<8x128xf32>
      %25 = arith.mulf %24, %23 : vector<8x128xf32>
      %26 = arith.addf %20, %25 : vector<8x128xf32>
      %27 = vector.extract_strided_slice %15 {offsets = [0, 2], sizes = [8, 1], strides = [1, 1]} : vector<8x4xf32> to vector<8x1xf32>
      %c2 = arith.constant 2 : index
      %c0_23 = arith.constant 0 : index
      %c0_24 = arith.constant 0 : index
      %28 = vector.load %arg3[%c2, %c0_23, %c0_24] : memref<4x8x128xf32, #tpu.memory_space<vmem>>, vector<1x8x128xf32>
      %29 = vector.shape_cast %28 : vector<1x8x128xf32> to vector<8x128xf32>
      %30 = vector.broadcast %27 : vector<8x1xf32> to vector<8x128xf32>
      %31 = arith.mulf %30, %29 : vector<8x128xf32>
      %32 = arith.addf %26, %31 : vector<8x128xf32>
      %33 = vector.extract_strided_slice %15 {offsets = [0, 3], sizes = [8, 1], strides = [1, 1]} : vector<8x4xf32> to vector<8x1xf32>
      %c3 = arith.constant 3 : index
      %c0_25 = arith.constant 0 : index
      %c0_26 = arith.constant 0 : index
      %34 = vector.load %arg3[%c3, %c0_25, %c0_26] : memref<4x8x128xf32, #tpu.memory_space<vmem>>, vector<1x8x128xf32>
      %35 = vector.shape_cast %34 : vector<1x8x128xf32> to vector<8x128xf32>
      %36 = vector.broadcast %33 : vector<8x1xf32> to vector<8x128xf32>
      %37 = arith.mulf %36, %35 : vector<8x128xf32>
      %38 = arith.addf %32, %37 : vector<8x128xf32>
      %c1_i32_27 = arith.constant 1 : i32
      %39 = tpu.dynamic_rotate %arg9 by %c1_i32_27 dim 1 : vector<8x128xf32>, i32 -> vector<8x128xf32>
      %40 = arith.mulf %38, %38 : vector<8x128xf32>
      %cst_28 = arith.constant 0.0833333358 : f32
      %41 = vector.broadcast %cst_28 : f32 to vector<8x128xf32>
      %42 = arith.mulf %40, %41 : vector<8x128xf32>
      %cst_29 = arith.constant 5.000000e-01 : f32
      %43 = vector.broadcast %cst_29 : f32 to vector<8x128xf32>
      %44 = arith.mulf %43, %38 : vector<8x128xf32>
      %cst_30 = arith.constant 1.000000e+00 : f32
      %45 = vector.broadcast %cst_30 : f32 to vector<8x128xf32>
      %46 = arith.addf %45, %44 : vector<8x128xf32>
      %47 = arith.addf %46, %42 : vector<8x128xf32>
      %cst_31 = arith.constant 1.000000e+00 : f32
      %48 = vector.broadcast %cst_31 : f32 to vector<8x128xf32>
      %49 = arith.subf %48, %42 : vector<8x128xf32>
      %c0_i32_32 = arith.constant 0 : i32
      %50 = vector.broadcast %c0_i32_32 : i32 to vector<8x128xi32>
      %51 = arith.cmpi eq, %0, %50 : vector<8x128xi32>
      %cst_33 = arith.constant 0.000000e+00 : f32
      %52 = vector.broadcast %cst_33 : f32 to vector<8x128xf32>
      %53 = arith.select %51, %52, %47 : vector<8x128xi1>, vector<8x128xf32>
      %c0_i32_34 = arith.constant 0 : i32
      %54 = vector.broadcast %c0_i32_34 : i32 to vector<8x128xi32>
      %55 = arith.cmpi eq, %0, %54 : vector<8x128xi32>
      %56 = arith.mulf %47, %arg9 : vector<8x128xf32>
      %57 = arith.mulf %49, %39 : vector<8x128xf32>
      %58 = arith.subf %56, %57 : vector<8x128xf32>
      %cst_35 = arith.constant 1.000000e+00 : f32
      %59 = vector.broadcast %cst_35 : f32 to vector<8x128xf32>
      %60 = arith.select %55, %59, %58 : vector<8x128xi1>, vector<8x128xf32>
      %c1_i32_36 = arith.constant 1 : i32
      %61 = vector.broadcast %c1_i32_36 : i32 to vector<8x128xi32>
      %62 = arith.cmpi sge, %0, %61 : vector<8x128xi32>
      %c1_i32_37 = arith.constant 1 : i32
      %63 = tpu.dynamic_rotate %53 by %c1_i32_37 dim 1 : vector<8x128xf32>, i32 -> vector<8x128xf32>
      %cst_38 = arith.constant 1.000000e+00 : f32
      %64 = vector.broadcast %cst_38 : f32 to vector<8x128xf32>
      %65 = arith.select %62, %63, %64 : vector<8x128xi1>, vector<8x128xf32>
      %c1_i32_39 = arith.constant 1 : i32
      %66 = vector.broadcast %c1_i32_39 : i32 to vector<8x128xi32>
      %67 = arith.cmpi sge, %0, %66 : vector<8x128xi32>
      %c1_i32_40 = arith.constant 1 : i32
      %68 = tpu.dynamic_rotate %60 by %c1_i32_40 dim 1 : vector<8x128xf32>, i32 -> vector<8x128xf32>
      %cst_41 = arith.constant 0.000000e+00 : f32
      %69 = vector.broadcast %cst_41 : f32 to vector<8x128xf32>
      %70 = arith.select %67, %68, %69 : vector<8x128xi1>, vector<8x128xf32>
      %71 = arith.mulf %53, %70 : vector<8x128xf32>
      %72 = arith.addf %71, %60 : vector<8x128xf32>
      %73 = arith.mulf %53, %65 : vector<8x128xf32>
      %c2_i32 = arith.constant 2 : i32
      %74 = vector.broadcast %c2_i32 : i32 to vector<8x128xi32>
      %75 = arith.cmpi sge, %0, %74 : vector<8x128xi32>
      %c2_i32_42 = arith.constant 2 : i32
      %76 = tpu.dynamic_rotate %73 by %c2_i32_42 dim 1 : vector<8x128xf32>, i32 -> vector<8x128xf32>
      %cst_43 = arith.constant 1.000000e+00 : f32
      %77 = vector.broadcast %cst_43 : f32 to vector<8x128xf32>
      %78 = arith.select %75, %76, %77 : vector<8x128xi1>, vector<8x128xf32>
      %c2_i32_44 = arith.constant 2 : i32
      %79 = vector.broadcast %c2_i32_44 : i32 to vector<8x128xi32>
      %80 = arith.cmpi sge, %0, %79 : vector<8x128xi32>
      %c2_i32_45 = arith.constant 2 : i32
      %81 = tpu.dynamic_rotate %72 by %c2_i32_45 dim 1 : vector<8x128xf32>, i32 -> vector<8x128xf32>
      %cst_46 = arith.constant 0.000000e+00 : f32
      %82 = vector.broadcast %cst_46 : f32 to vector<8x128xf32>
      %83 = arith.select %80, %81, %82 : vector<8x128xi1>, vector<8x128xf32>
      %84 = arith.mulf %73, %83 : vector<8x128xf32>
      %85 = arith.addf %84, %72 : vector<8x128xf32>
      %86 = arith.mulf %73, %78 : vector<8x128xf32>
      %c4_i32 = arith.constant 4 : i32
      %87 = vector.broadcast %c4_i32 : i32 to vector<8x128xi32>
      %88 = arith.cmpi sge, %0, %87 : vector<8x128xi32>
      %c4_i32_47 = arith.constant 4 : i32
      %89 = tpu.dynamic_rotate %85 by %c4_i32_47 dim 1 : vector<8x128xf32>, i32 -> vector<8x128xf32>
      %cst_48 = arith.constant 0.000000e+00 : f32
      %90 = vector.broadcast %cst_48 : f32 to vector<8x128xf32>
      %91 = arith.select %88, %89, %90 : vector<8x128xi1>, vector<8x128xf32>
      %92 = arith.mulf %86, %91 : vector<8x128xf32>
      %93 = arith.addf %92, %85 : vector<8x128xf32>
      scf.yield %93 : vector<8x128xf32>
    }
    %c7_i32_0 = arith.constant 7 : i32
    %c0 = arith.constant 0 : index
    %c0_1 = arith.constant 0 : index
    %4 = vector.load %arg5[%c0, %c0_1] : memref<8x128xf32, #tpu.memory_space<vmem>>, vector<8x128xf32>
    tpu.vector_store %arg5[%c0, %c0_1], %3 {strides = array<i32>} : memref<8x128xf32, #tpu.memory_space<vmem>>, vector<8x128xf32>,
    %cst_2 = arith.constant 1.000000e+00 : f32
    %5 = vector.broadcast %cst_2 : f32 to vector<8x128xf32>
    %c0_i32_3 = arith.constant 0 : i32
    %c7_i32_4 = arith.constant 7 : i32
    %6 = arith.addi %c0_i32_3, %c7_i32_4 : i32
    %c1_i32_5 = arith.constant 1 : i32
    %7 = scf.for %arg8 = %c0_i32_3 to %6 step %c1_i32_5 iter_args(%arg9 = %5) -> (vector<8x128xf32>)  : i32 {
      %13 = arith.index_cast %arg8 : i32 to index
      %c0_16 = arith.constant 0 : index
      %c0_17 = arith.constant 0 : index
      %14 = vector.load %arg2[%13, %c0_16, %c0_17] : memref<7x8x4xf32, #tpu.memory_space<vmem>>, vector<1x8x4xf32>
      %15 = vector.shape_cast %14 : vector<1x8x4xf32> to vector<8x4xf32>
      %16 = vector.extract_strided_slice %15 {offsets = [0, 0], sizes = [8, 1], strides = [1, 1]} : vector<8x4xf32> to vector<8x1xf32>
      %c0_18 = arith.constant 0 : index
      %c0_19 = arith.constant 0 : index
      %c0_20 = arith.constant 0 : index
      %17 = vector.load %arg4[%c0_18, %c0_19, %c0_20] : memref<4x8x128xf32, #tpu.memory_space<vmem>>, vector<1x8x128xf32>
      %18 = vector.shape_cast %17 : vector<1x8x128xf32> to vector<8x128xf32>
      %19 = vector.broadcast %16 : vector<8x1xf32> to vector<8x128xf32>
      %20 = arith.mulf %19, %18 : vector<8x128xf32>
      %21 = vector.extract_strided_slice %15 {offsets = [0, 1], sizes = [8, 1], strides = [1, 1]} : vector<8x4xf32> to vector<8x1xf32>
      %c1 = arith.constant 1 : index
      %c0_21 = arith.constant 0 : index
      %c0_22 = arith.constant 0 : index
      %22 = vector.load %arg4[%c1, %c0_21, %c0_22] : memref<4x8x128xf32, #tpu.memory_space<vmem>>, vector<1x8x128xf32>
      %23 = vector.shape_cast %22 : vector<1x8x128xf32> to vector<8x128xf32>
      %24 = vector.broadcast %21 : vector<8x1xf32> to vector<8x128xf32>
      %25 = arith.mulf %24, %23 : vector<8x128xf32>
      %26 = arith.addf %20, %25 : vector<8x128xf32>
      %27 = vector.extract_strided_slice %15 {offsets = [0, 2], sizes = [8, 1], strides = [1, 1]} : vector<8x4xf32> to vector<8x1xf32>
      %c2 = arith.constant 2 : index
      %c0_23 = arith.constant 0 : index
      %c0_24 = arith.constant 0 : index
      %28 = vector.load %arg4[%c2, %c0_23, %c0_24] : memref<4x8x128xf32, #tpu.memory_space<vmem>>, vector<1x8x128xf32>
      %29 = vector.shape_cast %28 : vector<1x8x128xf32> to vector<8x128xf32>
      %30 = vector.broadcast %27 : vector<8x1xf32> to vector<8x128xf32>
      %31 = arith.mulf %30, %29 : vector<8x128xf32>
      %32 = arith.addf %26, %31 : vector<8x128xf32>
      %33 = vector.extract_strided_slice %15 {offsets = [0, 3], sizes = [8, 1], strides = [1, 1]} : vector<8x4xf32> to vector<8x1xf32>
      %c3 = arith.constant 3 : index
      %c0_25 = arith.constant 0 : index
      %c0_26 = arith.constant 0 : index
      %34 = vector.load %arg4[%c3, %c0_25, %c0_26] : memref<4x8x128xf32, #tpu.memory_space<vmem>>, vector<1x8x128xf32>
      %35 = vector.shape_cast %34 : vector<1x8x128xf32> to vector<8x128xf32>
      %36 = vector.broadcast %33 : vector<8x1xf32> to vector<8x128xf32>
      %37 = arith.mulf %36, %35 : vector<8x128xf32>
      %38 = arith.addf %32, %37 : vector<8x128xf32>
      %c1_i32_27 = arith.constant 1 : i32
      %39 = tpu.dynamic_rotate %arg9 by %c1_i32_27 dim 1 : vector<8x128xf32>, i32 -> vector<8x128xf32>
      %40 = arith.mulf %38, %38 : vector<8x128xf32>
      %cst_28 = arith.constant 0.0833333358 : f32
      %41 = vector.broadcast %cst_28 : f32 to vector<8x128xf32>
      %42 = arith.mulf %40, %41 : vector<8x128xf32>
      %cst_29 = arith.constant 5.000000e-01 : f32
      %43 = vector.broadcast %cst_29 : f32 to vector<8x128xf32>
      %44 = arith.mulf %43, %38 : vector<8x128xf32>
      %cst_30 = arith.constant 1.000000e+00 : f32
      %45 = vector.broadcast %cst_30 : f32 to vector<8x128xf32>
      %46 = arith.addf %45, %44 : vector<8x128xf32>
      %47 = arith.addf %46, %42 : vector<8x128xf32>
      %cst_31 = arith.constant 1.000000e+00 : f32
      %48 = vector.broadcast %cst_31 : f32 to vector<8x128xf32>
      %49 = arith.subf %48, %42 : vector<8x128xf32>
      %c0_i32_32 = arith.constant 0 : i32
      %50 = vector.broadcast %c0_i32_32 : i32 to vector<8x128xi32>
      %51 = arith.cmpi eq, %0, %50 : vector<8x128xi32>
      %cst_33 = arith.constant 0.000000e+00 : f32
      %52 = vector.broadcast %cst_33 : f32 to vector<8x128xf32>
      %53 = arith.select %51, %52, %47 : vector<8x128xi1>, vector<8x128xf32>
      %c0_i32_34 = arith.constant 0 : i32
      %54 = vector.broadcast %c0_i32_34 : i32 to vector<8x128xi32>
      %55 = arith.cmpi eq, %0, %54 : vector<8x128xi32>
      %56 = arith.mulf %47, %arg9 : vector<8x128xf32>
      %57 = arith.mulf %49, %39 : vector<8x128xf32>
      %58 = arith.subf %56, %57 : vector<8x128xf32>
      %cst_35 = arith.constant 1.000000e+00 : f32
      %59 = vector.broadcast %cst_35 : f32 to vector<8x128xf32>
      %60 = arith.select %55, %59, %58 : vector<8x128xi1>, vector<8x128xf32>
      %c1_i32_36 = arith.constant 1 : i32
      %61 = vector.broadcast %c1_i32_36 : i32 to vector<8x128xi32>
      %62 = arith.cmpi sge, %0, %61 : vector<8x128xi32>
      %c1_i32_37 = arith.constant 1 : i32
      %63 = tpu.dynamic_rotate %53 by %c1_i32_37 dim 1 : vector<8x128xf32>, i32 -> vector<8x128xf32>
      %cst_38 = arith.constant 1.000000e+00 : f32
      %64 = vector.broadcast %cst_38 : f32 to vector<8x128xf32>
      %65 = arith.select %62, %63, %64 : vector<8x128xi1>, vector<8x128xf32>
      %c1_i32_39 = arith.constant 1 : i32
      %66 = vector.broadcast %c1_i32_39 : i32 to vector<8x128xi32>
      %67 = arith.cmpi sge, %0, %66 : vector<8x128xi32>
      %c1_i32_40 = arith.constant 1 : i32
      %68 = tpu.dynamic_rotate %60 by %c1_i32_40 dim 1 : vector<8x128xf32>, i32 -> vector<8x128xf32>
      %cst_41 = arith.constant 0.000000e+00 : f32
      %69 = vector.broadcast %cst_41 : f32 to vector<8x128xf32>
      %70 = arith.select %67, %68, %69 : vector<8x128xi1>, vector<8x128xf32>
      %71 = arith.mulf %53, %70 : vector<8x128xf32>
      %72 = arith.addf %71, %60 : vector<8x128xf32>
      %73 = arith.mulf %53, %65 : vector<8x128xf32>
      %c2_i32 = arith.constant 2 : i32
      %74 = vector.broadcast %c2_i32 : i32 to vector<8x128xi32>
      %75 = arith.cmpi sge, %0, %74 : vector<8x128xi32>
      %c2_i32_42 = arith.constant 2 : i32
      %76 = tpu.dynamic_rotate %73 by %c2_i32_42 dim 1 : vector<8x128xf32>, i32 -> vector<8x128xf32>
      %cst_43 = arith.constant 1.000000e+00 : f32
      %77 = vector.broadcast %cst_43 : f32 to vector<8x128xf32>
      %78 = arith.select %75, %76, %77 : vector<8x128xi1>, vector<8x128xf32>
      %c2_i32_44 = arith.constant 2 : i32
      %79 = vector.broadcast %c2_i32_44 : i32 to vector<8x128xi32>
      %80 = arith.cmpi sge, %0, %79 : vector<8x128xi32>
      %c2_i32_45 = arith.constant 2 : i32
      %81 = tpu.dynamic_rotate %72 by %c2_i32_45 dim 1 : vector<8x128xf32>, i32 -> vector<8x128xf32>
      %cst_46 = arith.constant 0.000000e+00 : f32
      %82 = vector.broadcast %cst_46 : f32 to vector<8x128xf32>
      %83 = arith.select %80, %81, %82 : vector<8x128xi1>, vector<8x128xf32>
      %84 = arith.mulf %73, %83 : vector<8x128xf32>
      %85 = arith.addf %84, %72 : vector<8x128xf32>
      %86 = arith.mulf %73, %78 : vector<8x128xf32>
      %c4_i32 = arith.constant 4 : i32
      %87 = vector.broadcast %c4_i32 : i32 to vector<8x128xi32>
      %88 = arith.cmpi sge, %0, %87 : vector<8x128xi32>
      %c4_i32_47 = arith.constant 4 : i32
      %89 = tpu.dynamic_rotate %85 by %c4_i32_47 dim 1 : vector<8x128xf32>, i32 -> vector<8x128xf32>
      %cst_48 = arith.constant 0.000000e+00 : f32
      %90 = vector.broadcast %cst_48 : f32 to vector<8x128xf32>
      %91 = arith.select %88, %89, %90 : vector<8x128xi1>, vector<8x128xf32>
      %92 = arith.mulf %86, %91 : vector<8x128xf32>
      %93 = arith.addf %92, %85 : vector<8x128xf32>
      scf.yield %93 : vector<8x128xf32>
    }
    %c7_i32_6 = arith.constant 7 : i32
    %c0_7 = arith.constant 0 : index
    %c0_8 = arith.constant 0 : index
    %8 = vector.load %arg6[%c0_7, %c0_8] : memref<8x128xf32, #tpu.memory_space<vmem>>, vector<8x128xf32>
    tpu.vector_store %arg6[%c0_7, %c0_8], %7 {strides = array<i32>} : memref<8x128xf32, #tpu.memory_space<vmem>>, vector<8x128xf32>,
    %cst_9 = arith.constant 1.000000e+00 : f32
    %9 = vector.broadcast %cst_9 : f32 to vector<8x128xf32>
    %c0_i32_10 = arith.constant 0 : i32
    %c7_i32_11 = arith.constant 7 : i32
    %10 = arith.addi %c0_i32_10, %c7_i32_11 : i32
    %c1_i32_12 = arith.constant 1 : i32
    %11 = scf.for %arg8 = %c0_i32_10 to %10 step %c1_i32_12 iter_args(%arg9 = %9) -> (vector<8x128xf32>)  : i32 {
      %13 = arith.index_cast %arg8 : i32 to index
      %c0_16 = arith.constant 0 : index
      %c0_17 = arith.constant 0 : index
      %14 = vector.load %arg1[%13, %c0_16, %c0_17] : memref<7x8x4xf32, #tpu.memory_space<vmem>>, vector<1x8x4xf32>
      %15 = vector.shape_cast %14 : vector<1x8x4xf32> to vector<8x4xf32>
      %16 = vector.extract_strided_slice %15 {offsets = [0, 0], sizes = [8, 1], strides = [1, 1]} : vector<8x4xf32> to vector<8x1xf32>
      %c0_18 = arith.constant 0 : index
      %c0_19 = arith.constant 0 : index
      %c0_20 = arith.constant 0 : index
      %17 = vector.load %arg4[%c0_18, %c0_19, %c0_20] : memref<4x8x128xf32, #tpu.memory_space<vmem>>, vector<1x8x128xf32>
      %18 = vector.shape_cast %17 : vector<1x8x128xf32> to vector<8x128xf32>
      %19 = vector.broadcast %16 : vector<8x1xf32> to vector<8x128xf32>
      %20 = arith.mulf %19, %18 : vector<8x128xf32>
      %21 = vector.extract_strided_slice %15 {offsets = [0, 1], sizes = [8, 1], strides = [1, 1]} : vector<8x4xf32> to vector<8x1xf32>
      %c1 = arith.constant 1 : index
      %c0_21 = arith.constant 0 : index
      %c0_22 = arith.constant 0 : index
      %22 = vector.load %arg4[%c1, %c0_21, %c0_22] : memref<4x8x128xf32, #tpu.memory_space<vmem>>, vector<1x8x128xf32>
      %23 = vector.shape_cast %22 : vector<1x8x128xf32> to vector<8x128xf32>
      %24 = vector.broadcast %21 : vector<8x1xf32> to vector<8x128xf32>
      %25 = arith.mulf %24, %23 : vector<8x128xf32>
      %26 = arith.addf %20, %25 : vector<8x128xf32>
      %27 = vector.extract_strided_slice %15 {offsets = [0, 2], sizes = [8, 1], strides = [1, 1]} : vector<8x4xf32> to vector<8x1xf32>
      %c2 = arith.constant 2 : index
      %c0_23 = arith.constant 0 : index
      %c0_24 = arith.constant 0 : index
      %28 = vector.load %arg4[%c2, %c0_23, %c0_24] : memref<4x8x128xf32, #tpu.memory_space<vmem>>, vector<1x8x128xf32>
      %29 = vector.shape_cast %28 : vector<1x8x128xf32> to vector<8x128xf32>
      %30 = vector.broadcast %27 : vector<8x1xf32> to vector<8x128xf32>
      %31 = arith.mulf %30, %29 : vector<8x128xf32>
      %32 = arith.addf %26, %31 : vector<8x128xf32>
      %33 = vector.extract_strided_slice %15 {offsets = [0, 3], sizes = [8, 1], strides = [1, 1]} : vector<8x4xf32> to vector<8x1xf32>
      %c3 = arith.constant 3 : index
      %c0_25 = arith.constant 0 : index
      %c0_26 = arith.constant 0 : index
      %34 = vector.load %arg4[%c3, %c0_25, %c0_26] : memref<4x8x128xf32, #tpu.memory_space<vmem>>, vector<1x8x128xf32>
      %35 = vector.shape_cast %34 : vector<1x8x128xf32> to vector<8x128xf32>
      %36 = vector.broadcast %33 : vector<8x1xf32> to vector<8x128xf32>
      %37 = arith.mulf %36, %35 : vector<8x128xf32>
      %38 = arith.addf %32, %37 : vector<8x128xf32>
      %c1_i32_27 = arith.constant 1 : i32
      %39 = tpu.dynamic_rotate %arg9 by %c1_i32_27 dim 1 : vector<8x128xf32>, i32 -> vector<8x128xf32>
      %40 = arith.mulf %38, %38 : vector<8x128xf32>
      %cst_28 = arith.constant 0.0833333358 : f32
      %41 = vector.broadcast %cst_28 : f32 to vector<8x128xf32>
      %42 = arith.mulf %40, %41 : vector<8x128xf32>
      %cst_29 = arith.constant 5.000000e-01 : f32
      %43 = vector.broadcast %cst_29 : f32 to vector<8x128xf32>
      %44 = arith.mulf %43, %38 : vector<8x128xf32>
      %cst_30 = arith.constant 1.000000e+00 : f32
      %45 = vector.broadcast %cst_30 : f32 to vector<8x128xf32>
      %46 = arith.addf %45, %44 : vector<8x128xf32>
      %47 = arith.addf %46, %42 : vector<8x128xf32>
      %cst_31 = arith.constant 1.000000e+00 : f32
      %48 = vector.broadcast %cst_31 : f32 to vector<8x128xf32>
      %49 = arith.subf %48, %42 : vector<8x128xf32>
      %c0_i32_32 = arith.constant 0 : i32
      %50 = vector.broadcast %c0_i32_32 : i32 to vector<8x128xi32>
      %51 = arith.cmpi eq, %0, %50 : vector<8x128xi32>
      %cst_33 = arith.constant 0.000000e+00 : f32
      %52 = vector.broadcast %cst_33 : f32 to vector<8x128xf32>
      %53 = arith.select %51, %52, %47 : vector<8x128xi1>, vector<8x128xf32>
      %c0_i32_34 = arith.constant 0 : i32
      %54 = vector.broadcast %c0_i32_34 : i32 to vector<8x128xi32>
      %55 = arith.cmpi eq, %0, %54 : vector<8x128xi32>
      %56 = arith.mulf %47, %arg9 : vector<8x128xf32>
      %57 = arith.mulf %49, %39 : vector<8x128xf32>
      %58 = arith.subf %56, %57 : vector<8x128xf32>
      %cst_35 = arith.constant 1.000000e+00 : f32
      %59 = vector.broadcast %cst_35 : f32 to vector<8x128xf32>
      %60 = arith.select %55, %59, %58 : vector<8x128xi1>, vector<8x128xf32>
      %c1_i32_36 = arith.constant 1 : i32
      %61 = vector.broadcast %c1_i32_36 : i32 to vector<8x128xi32>
      %62 = arith.cmpi sge, %0, %61 : vector<8x128xi32>
      %c1_i32_37 = arith.constant 1 : i32
      %63 = tpu.dynamic_rotate %53 by %c1_i32_37 dim 1 : vector<8x128xf32>, i32 -> vector<8x128xf32>
      %cst_38 = arith.constant 1.000000e+00 : f32
      %64 = vector.broadcast %cst_38 : f32 to vector<8x128xf32>
      %65 = arith.select %62, %63, %64 : vector<8x128xi1>, vector<8x128xf32>
      %c1_i32_39 = arith.constant 1 : i32
      %66 = vector.broadcast %c1_i32_39 : i32 to vector<8x128xi32>
      %67 = arith.cmpi sge, %0, %66 : vector<8x128xi32>
      %c1_i32_40 = arith.constant 1 : i32
      %68 = tpu.dynamic_rotate %60 by %c1_i32_40 dim 1 : vector<8x128xf32>, i32 -> vector<8x128xf32>
      %cst_41 = arith.constant 0.000000e+00 : f32
      %69 = vector.broadcast %cst_41 : f32 to vector<8x128xf32>
      %70 = arith.select %67, %68, %69 : vector<8x128xi1>, vector<8x128xf32>
      %71 = arith.mulf %53, %70 : vector<8x128xf32>
      %72 = arith.addf %71, %60 : vector<8x128xf32>
      %73 = arith.mulf %53, %65 : vector<8x128xf32>
      %c2_i32 = arith.constant 2 : i32
      %74 = vector.broadcast %c2_i32 : i32 to vector<8x128xi32>
      %75 = arith.cmpi sge, %0, %74 : vector<8x128xi32>
      %c2_i32_42 = arith.constant 2 : i32
      %76 = tpu.dynamic_rotate %73 by %c2_i32_42 dim 1 : vector<8x128xf32>, i32 -> vector<8x128xf32>
      %cst_43 = arith.constant 1.000000e+00 : f32
      %77 = vector.broadcast %cst_43 : f32 to vector<8x128xf32>
      %78 = arith.select %75, %76, %77 : vector<8x128xi1>, vector<8x128xf32>
      %c2_i32_44 = arith.constant 2 : i32
      %79 = vector.broadcast %c2_i32_44 : i32 to vector<8x128xi32>
      %80 = arith.cmpi sge, %0, %79 : vector<8x128xi32>
      %c2_i32_45 = arith.constant 2 : i32
      %81 = tpu.dynamic_rotate %72 by %c2_i32_45 dim 1 : vector<8x128xf32>, i32 -> vector<8x128xf32>
      %cst_46 = arith.constant 0.000000e+00 : f32
      %82 = vector.broadcast %cst_46 : f32 to vector<8x128xf32>
      %83 = arith.select %80, %81, %82 : vector<8x128xi1>, vector<8x128xf32>
      %84 = arith.mulf %73, %83 : vector<8x128xf32>
      %85 = arith.addf %84, %72 : vector<8x128xf32>
      %86 = arith.mulf %73, %78 : vector<8x128xf32>
      %c4_i32 = arith.constant 4 : i32
      %87 = vector.broadcast %c4_i32 : i32 to vector<8x128xi32>
      %88 = arith.cmpi sge, %0, %87 : vector<8x128xi32>
      %c4_i32_47 = arith.constant 4 : i32
      %89 = tpu.dynamic_rotate %85 by %c4_i32_47 dim 1 : vector<8x128xf32>, i32 -> vector<8x128xf32>
      %cst_48 = arith.constant 0.000000e+00 : f32
      %90 = vector.broadcast %cst_48 : f32 to vector<8x128xf32>
      %91 = arith.select %88, %89, %90 : vector<8x128xi1>, vector<8x128xf32>
      %92 = arith.mulf %86, %91 : vector<8x128xf32>
      %93 = arith.addf %92, %85 : vector<8x128xf32>
      scf.yield %93 : vector<8x128xf32>
    }
    %c7_i32_13 = arith.constant 7 : i32
    %c0_14 = arith.constant 0 : index
    %c0_15 = arith.constant 0 : index
    %12 = vector.load %arg7[%c0_14, %c0_15] : memref<8x128xf32, #tpu.memory_space<vmem>>, vector<8x128xf32>
    tpu.vector_store %arg7[%c0_14, %c0_15], %11 {strides = array<i32>} : memref<8x128xf32, #tpu.memory_space<vmem>>, vector<8x128xf32>,
    return
  }
  func.func @transform_0(%arg0: i32) -> (i32, i32, i32) {
    %c0_i32 = arith.constant 0 : i32
    %c0_i32_0 = arith.constant 0 : i32
    %c0_i32_1 = arith.constant 0 : i32
    return %c0_i32, %arg0, %c0_i32_0 : i32, i32, i32
  }
  func.func @transform_1(%arg0: i32) -> (i32, i32, i32) {
    %c0_i32 = arith.constant 0 : i32
    %c0_i32_0 = arith.constant 0 : i32
    %c0_i32_1 = arith.constant 0 : i32
    return %c0_i32, %arg0, %c0_i32_0 : i32, i32, i32
  }
  func.func @transform_2(%arg0: i32) -> (i32, i32, i32) {
    %c0_i32 = arith.constant 0 : i32
    %c0_i32_0 = arith.constant 0 : i32
    %c0_i32_1 = arith.constant 0 : i32
    return %c0_i32, %arg0, %c0_i32_0 : i32, i32, i32
  }
  func.func @transform_3(%arg0: i32) -> (i32, i32, i32) {
    %c0_i32 = arith.constant 0 : i32
    %c0_i32_0 = arith.constant 0 : i32
    %c0_i32_1 = arith.constant 0 : i32
    return %c0_i32, %arg0, %c0_i32_0 : i32, i32, i32
  }
  func.func @transform_4(%arg0: i32) -> (i32, i32) {
    %c0_i32 = arith.constant 0 : i32
    %c0_i32_0 = arith.constant 0 : i32
    return %arg0, %c0_i32 : i32, i32
  }
  func.func @transform_5(%arg0: i32) -> (i32, i32) {
    %c0_i32 = arith.constant 0 : i32
    %c0_i32_0 = arith.constant 0 : i32
    return %arg0, %c0_i32 : i32, i32
  }
  func.func @transform_6(%arg0: i32) -> (i32, i32) {
    %c0_i32 = arith.constant 0 : i32
    %c0_i32_0 = arith.constant 0 : i32
    return %arg0, %c0_i32 : i32, i32
  }
}

</mosaic_0001>

<bundles_post_ra>
// kernel: tpu_custom_call.1
= control target key start
LH: loop header
LB: loop body
LE: loop exit
PB: predicated region body
PF: predicated region fallthrough
CT: control target
= control target key end

     0   :  { %12 = vsyncpa [#allocation3], 0  ;;  %s797_s0 = inlined_call_operand.vmem [shape: f32[7,8,4], index: 0, kind: input, shape index: {}]   ;;  %s798_s1 = inlined_call_operand.vmem [shape: f32[7,8,4], index: 1, kind: input, shape index: {}]   ;;  %s799_s2 = inlined_call_operand.vmem [shape: f32[4,8,128], index: 2, kind: input, shape index: {}]   ;;  %s800_s3 = inlined_call_operand.vmem [shape: f32[4,8,128], index: 3, kind: input, shape index: {}]   ;;  %s801_s4 = inlined_call_operand.hbm [shape: f32[8,128], index: 4, kind: output, shape index: {0}]   ;;  %s802_s5 = inlined_call_operand.hbm [shape: f32[8,128], index: 5, kind: output, shape index: {1}]   ;;  %s803_s6 = inlined_call_operand.hbm [shape: f32[8,128], index: 6, kind: output, shape index: {2}]  }
   0x1   :  { %13 = vsyncpa [#allocation5], 0  ;;  %v22_v0 = vlaneseq  ;;  %v619_v2 = vmov 1.0   ;;  %s621_s21 = smov 0  }
   0x3   :  { %v617_v1 = vand.u32 127, %v22_v0 }
   0x4 LB: > { %v558_v3 = vmov 0   ;;  %v559_v4 = vmov 2   ;;  %s341_s22 = sshll.u32 %s540_s21, 3  ;;  %v560_v6 = vmov 1   ;;  %v561_v7 = vmov 3   ;;  %s562_s26 = smov 1   ;;  %s540_s21 = sphi %s621_s21, %s29_s21   ;;  %v536_v2 = vphi %v619_v2, %v804_v2  }
   0x5   : > { %425 = vset.pattern.permute.xlu0 %v558_v3  ;;  %427 = vset.pattern.permute.xlu1 %v559_v4  ;;  %s32_s25 = scalar_lea.vmem %s797_s0, %s341_s22  ;;  %v34_v10 = vld [vmem:[%s799_s2] sm:$0xff]  ;;  %v342_v11 = vld [vmem:[%s799_s2 + $0x8] sm:$0xff]  ;;  %v343_v12 = vld [vmem:[%s799_s2 + $0x10] sm:$0xff]  ;;  %vm73_vm0 = vcmp.eq.s32.totalorder %v617_v1, 0  ;;  %vm79_vm1 = vcmp.ge.s32.totalorder %v617_v1, 1  ;;  %s563_s11 = smov 2  }
   0x6   : > { %v33_v5 = vld [vmem:[%s32_s25] sm:$0xff]  ;;  %v344_v14 = vld [vmem:[%s799_s2 + $0x18] sm:$0xff]  ;;  %vm89_vm2 = vcmp.ge.s32.totalorder %v617_v1, 2  ;;  %s564_s12 = smov 4   ;;  %vm99_vm3 = vcmp.ge.s32.totalorder %v617_v1, 4  ;;  %s29_s21 = sadd.s32 1, %s540_s21  }
   0x7   : > { %37 = vperm.xlu0 %425, %v33_v5   ;;  %52 = vperm.xlu1 %427, %v33_v5   ;;  %p26_p0 = scmp.ge.s32.totalorder %s29_s21, 7  }
   0x8   :  { %v669_v53 = vmov (%p26_p0), 1.0   ;;  %s671_s13 = smov (%p26_p0), 0  }
   0xb   : > { %426 = vset.pattern.permute.xlu0 %v560_v6  ;;  %428 = vset.pattern.permute.xlu1 %v561_v7 }
   0xc   : > { %44 = vperm.xlu0 %426, %v33_v5   ;;  %60 = vperm.xlu1 %428, %v33_v5  }
  0x10   : > { %65 = vrot.lane.b32.xlu1 %v536_v2, %s562_s26  ;;  %429 = vset.pattern.permute.xlu0 %v561_v7 }
  0x86   : > { %v38_v8 = vpop.permute.xlu0 %37  ;;  %v53_v9 = vpop.permute.xlu1 %52 }
  0x87   : > { %v40_v16 = vmul.f32 %v38_v8, %v34_v10  ;;  %v55_v18 = vmul.f32 %v343_v12, %v53_v9 }
  0x8b   : > { %v45_v13 = vpop.permute.xlu0 %44  ;;  %v61_v15 = vpop.permute.xlu1 %60 }
  0x8c   : > { %v47_v17 = vmul.f32 %v342_v11, %v45_v13  ;;  %v63_v20 = vmul.f32 %v344_v14, %v61_v15 }
  0x8e   : > { %v48_v19 = vadd.f32 %v47_v17, %v40_v16 }
  0x8f   : > { %v66_v27 = vpop.permute.xlu1 %65 }
  0x90   : > { %v56_v21 = vadd.f32 %v55_v18, %v48_v19 }
  0x92   : > { %v64_v22 = vadd.f32 %v63_v20, %v56_v21 }
  0x94   : > { %v67_v23 = vmul.f32 %v64_v22, %v64_v22  ;;  %v69_v24 = vmul.f32 0.5, %v64_v22 }
  0x96   : > { %v70_v25 = vadd.f32 1.0, %v69_v24  ;;  %v68_v26 = vmul.f32 0.083333336, %v67_v23 }
  0x98   : > { %v71_v28 = vadd.f32 %v70_v25, %v68_v26  ;;  %v72_v29 = vsub.f32 1.0, %v68_v26 }
  0x9a   : > { %v75_v30 = vmul.f32 %v536_v2, %v71_v28  ;;  %v76_v31 = vmul.f32 %v72_v29, %v66_v27  ;;  %v74_v32 = vsel %vm73_vm0, 0.0, %v71_v28 }
  0x9b   : > { %80 = vrot.lane.b32.xlu1 %v74_v32, %s562_s26 }
  0x9c   : > { %v77_v33 = vsub.f32 %v75_v30, %v76_v31 }
  0x9e   : > { %v78_v34 = vsel %vm73_vm0, 1.0, %v77_v33 }
  0x9f   : > { %83 = vrot.lane.b32.xlu0 %v78_v34, %s562_s26 }
 0x10d   : > { %v81_v35 = vpop.permute.xlu1 %80 }
 0x10e   : > { %v82_v36 = vsel %vm79_vm1, %v81_v35, 1.0 }
 0x10f   : > { %v88_v37 = vmul.f32 %v82_v36, %v74_v32 }
 0x111   : > { %90 = vrot.lane.b32.xlu1 %v88_v37, %s563_s11  ;;  %v84_v38 = vpop.permute.xlu0 %83 }
 0x112   : > { %v85_v39 = vsel %vm79_vm1, %v84_v38, 0.0 }
 0x113   : > { %v86_v40 = vmul.f32 %v85_v39, %v74_v32 }
 0x115   : > { %v87_v41 = vadd.f32 %v86_v40, %v78_v34 }
 0x117   : > { %93 = vrot.lane.b32.xlu0 %v87_v41, %s563_s11 }
 0x183   : > { %v91_v46 = vpop.permute.xlu1 %90 }
 0x184   : > { %v92_v47 = vsel %vm89_vm2, %v91_v46, 1.0 }
 0x185   : > { %v98_v48 = vmul.f32 %v92_v47, %v88_v37 }
 0x189   : > { %v94_v42 = vpop.permute.xlu0 %93 }
 0x18a   : > { %v95_v43 = vsel %vm89_vm2, %v94_v42, 0.0 }
 0x18b   : > { %v96_v44 = vmul.f32 %v95_v43, %v88_v37 }
 0x18d   : > { %v97_v45 = vadd.f32 %v96_v44, %v87_v41 }
 0x18f   : > { %100 = vrot.lane.b32.xlu0 %v97_v45, %s564_s12 }
 0x201   : > { %v101_v49 = vpop.permute.xlu0 %100  ;;  %28 = sbr.rel (!%p26_p0) target bundleno = 4 (0x4), region = 85 }
 0x202   : > { %v102_v50 = vsel %vm99_vm3, %v101_v49, 0.0 }
 0x203   : > { %v103_v51 = vmul.f32 %v102_v50, %v98_v48 }
 0x205   : > { %v104_v52 = vadd.f32 %v103_v51, %v97_v45  }
 0x207   : > { %v804_v2 = vmov %v104_v52  ;;  %105 = vst [vmem:[#allocation2] sm:$0xff] (%p26_p0), %v104_v52 }
 0x208 LB: > { %v565_v54 = vmov 0   ;;  %v566_v55 = vmov 2   ;;  %s345_s14 = sshll.u32 %s548_s13, 3  ;;  %v567_v57 = vmov 1   ;;  %v568_v58 = vmov 3   ;;  %s569_s17 = smov 1   ;;  %s548_s13 = sphi %s671_s13, %s111_s13   ;;  %v544_v53 = vphi %v669_v53, %v805_v53  }
 0x209   : > { %430 = vset.pattern.permute.xlu0 %v565_v54  ;;  %432 = vset.pattern.permute.xlu1 %v566_v55  ;;  %s114_s2 = scalar_lea.vmem %s798_s1, %s345_s14  ;;  %v116_v61 = vld [vmem:[%s800_s3] sm:$0xff]  ;;  %v346_v62 = vld [vmem:[%s800_s3 + $0x8] sm:$0xff]  ;;  %v347_v63 = vld [vmem:[%s800_s3 + $0x10] sm:$0xff]  ;;  %s570_s26 = smov 2  }
 0x20a   : > { %v115_v56 = vld [vmem:[%s114_s2] sm:$0xff]  ;;  %v348_v2 = vld [vmem:[%s800_s3 + $0x18] sm:$0xff]  ;;  %s571_s27 = smov 4   ;;  %s111_s13 = sadd.s32 1, %s548_s13  }
 0x20b   : > { %119 = vperm.xlu0 %430, %v115_v56   ;;  %134 = vperm.xlu1 %432, %v115_v56   ;;  %p108_p1 = scmp.ge.s32.totalorder %s111_s13, 7  }
 0x20c   :  { %v715_v41 = vmov (%p108_p1), 1.0   ;;  %s717_s28 = smov (%p108_p1), 0  }
 0x20f   : > { %431 = vset.pattern.permute.xlu0 %v567_v57  ;;  %433 = vset.pattern.permute.xlu1 %v568_v58 }
 0x210   : > { %126 = vperm.xlu0 %431, %v115_v56   ;;  %142 = vperm.xlu1 %433, %v115_v56  }
 0x214   : > { %147 = vrot.lane.b32.xlu1 %v544_v53, %s569_s17  ;;  %434 = vset.pattern.permute.xlu0 %v568_v58 }
 0x28a   : > { %v120_v59 = vpop.permute.xlu0 %119  ;;  %v135_v60 = vpop.permute.xlu1 %134 }
 0x28b   : > { %v122_v4 = vmul.f32 %v120_v59, %v116_v61  ;;  %v137_v6 = vmul.f32 %v347_v63, %v135_v60 }
 0x28f   : > { %v127_v0 = vpop.permute.xlu0 %126  ;;  %v143_v3 = vpop.permute.xlu1 %142 }
 0x290   : > { %v129_v5 = vmul.f32 %v346_v62, %v127_v0  ;;  %v145_v8 = vmul.f32 %v348_v2, %v143_v3 }
 0x292   : > { %v130_v7 = vadd.f32 %v129_v5, %v122_v4 }
 0x293   : > { %v148_v15 = vpop.permute.xlu1 %147 }
 0x294   : > { %v138_v9 = vadd.f32 %v137_v6, %v130_v7 }
 0x296   : > { %v146_v10 = vadd.f32 %v145_v8, %v138_v9 }
 0x298   : > { %v149_v11 = vmul.f32 %v146_v10, %v146_v10  ;;  %v151_v12 = vmul.f32 0.5, %v146_v10 }
 0x29a   : > { %v152_v13 = vadd.f32 1.0, %v151_v12  ;;  %v150_v14 = vmul.f32 0.083333336, %v149_v11 }
 0x29c   : > { %v154_v16 = vsub.f32 1.0, %v150_v14  ;;  %v153_v17 = vadd.f32 %v152_v13, %v150_v14 }
 0x29e   : > { %v158_v18 = vmul.f32 %v154_v16, %v148_v15  ;;  %v156_v19 = vsel %vm73_vm0, 0.0, %v153_v17  ;;  %v157_v20 = vmul.f32 %v544_v53, %v153_v17 }
 0x29f   : > { %162 = vrot.lane.b32.xlu1 %v156_v19, %s569_s17 }
 0x2a0   : > { %v159_v21 = vsub.f32 %v157_v20, %v158_v18 }
 0x2a2   : > { %v160_v22 = vsel %vm73_vm0, 1.0, %v159_v21 }
 0x2a3   : > { %165 = vrot.lane.b32.xlu0 %v160_v22, %s569_s17 }
 0x311   : > { %v163_v23 = vpop.permute.xlu1 %162 }
 0x312   : > { %v164_v24 = vsel %vm79_vm1, %v163_v23, 1.0 }
 0x313   : > { %v170_v25 = vmul.f32 %v164_v24, %v156_v19 }
 0x315   : > { %172 = vrot.lane.b32.xlu1 %v170_v25, %s570_s26  ;;  %v166_v26 = vpop.permute.xlu0 %165 }
 0x316   : > { %v167_v27 = vsel %vm79_vm1, %v166_v26, 0.0 }
 0x317   : > { %v168_v28 = vmul.f32 %v167_v27, %v156_v19 }
 0x319   : > { %v169_v29 = vadd.f32 %v168_v28, %v160_v22 }
 0x31b   : > { %175 = vrot.lane.b32.xlu0 %v169_v29, %s570_s26 }
 0x387   : > { %v173_v34 = vpop.permute.xlu1 %172 }
 0x388   : > { %v174_v35 = vsel %vm89_vm2, %v173_v34, 1.0 }
 0x389   : > { %v180_v36 = vmul.f32 %v174_v35, %v170_v25 }
 0x38d   : > { %v176_v30 = vpop.permute.xlu0 %175 }
 0x38e   : > { %v177_v31 = vsel %vm89_vm2, %v176_v30, 0.0 }
 0x38f   : > { %v178_v32 = vmul.f32 %v177_v31, %v170_v25 }
 0x391   : > { %v179_v33 = vadd.f32 %v178_v32, %v169_v29 }
 0x393   : > { %182 = vrot.lane.b32.xlu0 %v179_v33, %s571_s27 }
 0x405   : > { %v183_v37 = vpop.permute.xlu0 %182  ;;  %110 = sbr.rel (!%p108_p1) target bundleno = 520 (0x208), region = 96 }
 0x406   : > { %v184_v38 = vsel %vm99_vm3, %v183_v37, 0.0 }
 0x407   : > { %v185_v39 = vmul.f32 %v184_v38, %v180_v36 }
 0x409   : > { %v186_v40 = vadd.f32 %v185_v39, %v179_v33  }
 0x40b   : > { %v805_v53 = vmov %v186_v40  ;;  %187 = vst [vmem:[#allocation4] sm:$0xff] (%p108_p1), %v186_v40 }
 0x40c LB: > { %v572_v42 = vmov 0   ;;  %v573_v43 = vmov 2   ;;  %s349_s29 = sshll.u32 %s556_s28, 3  ;;  %v574_v45 = vmov 1   ;;  %v575_v46 = vmov 3   ;;  %s576_s8 = smov 1   ;;  %s556_s28 = sphi %s717_s28, %s193_s28   ;;  %v552_v41 = vphi %v715_v41, %v806_v41  }
 0x40d   : > { %435 = vset.pattern.permute.xlu0 %v572_v42  ;;  %437 = vset.pattern.permute.xlu1 %v573_v43  ;;  %s196_s1 = scalar_lea.vmem %s797_s0, %s349_s29  ;;  %v198_v49 = vld [vmem:[%s800_s3] sm:$0xff]  ;;  %v350_v50 = vld [vmem:[%s800_s3 + $0x8] sm:$0xff]  ;;  %v351_v51 = vld [vmem:[%s800_s3 + $0x10] sm:$0xff]  ;;  %s577_s2 = smov 2  }
 0x40e   : > { %v197_v44 = vld [vmem:[%s196_s1] sm:$0xff]  ;;  %v352_v53 = vld [vmem:[%s800_s3 + $0x18] sm:$0xff]  ;;  %s578_s17 = smov 4   ;;  %s193_s28 = sadd.s32 1, %s556_s28  }
 0x40f   : > { %201 = vperm.xlu0 %435, %v197_v44   ;;  %216 = vperm.xlu1 %437, %v197_v44   ;;  %p190_p2 = scmp.ge.s32.totalorder %s193_s28, 7  }
 0x410   :  { %s579_s18 = smov (%p190_p2), [#allocation4]   ;;  %s580_s20 = smov (%p190_p2), [#allocation2]  }
 0x411   :  { %s286_s19 = sshll.u32 (%p190_p2), %s579_s18, 4  ;;  %s276_s21 = sshll.u32 (%p190_p2), %s580_s20, 4  ;;  %s287_s19 = int_to_ptr.vmem [resolvable:$true] %s286_s19  ;;  %s277_s21 = int_to_ptr.vmem [resolvable:$true] %s276_s21 }
 0x412   :  { %s440_s22 = scalar_lea.vmem (%p190_p2), %s287_s19, 128  ;;  %p445_p4 = scmp.lt.s32.totalorder (%p190_p2), %s287_s19, %s287_s19 }
 0x413   : > { %436 = vset.pattern.permute.xlu0 %v574_v45  ;;  %438 = vset.pattern.permute.xlu1 %v575_v46  ;;  %p441_p3 = scmp.ne.s32.totalorder (%p190_p2), %s287_s19, %s440_s22  ;;  %p446_p5 = scmp.lt.s32.totalorder (%p190_p2), %s440_s22, %s440_s22 }
 0x414   : > { %208 = vperm.xlu0 %436, %v197_v44   ;;  %224 = vperm.xlu1 %438, %v197_v44  }
 0x415   :  { %p447_p6 = por (%p190_p2), %p446_p5, %p445_p4 }
 0x417   :  { %p448_p7 = pnand (%p190_p2), %p447_p6, %p441_p3 }
 0x418   : > { %229 = vrot.lane.b32.xlu1 %v552_v41, %s576_s8  ;;  %439 = vset.pattern.permute.xlu0 %v575_v46 }
 0x48e   : > { %v202_v47 = vpop.permute.xlu0 %201  ;;  %v217_v48 = vpop.permute.xlu1 %216 }
 0x48f   : > { %v204_v55 = vmul.f32 %v202_v47, %v198_v49  ;;  %v219_v57 = vmul.f32 %v351_v51, %v217_v48 }
 0x493   : > { %v209_v52 = vpop.permute.xlu0 %208  ;;  %v225_v54 = vpop.permute.xlu1 %224 }
 0x494   : > { %v211_v56 = vmul.f32 %v350_v50, %v209_v52  ;;  %v227_v59 = vmul.f32 %v352_v53, %v225_v54 }
 0x496   : > { %v212_v58 = vadd.f32 %v211_v56, %v204_v55 }
 0x497   : > { %v230_v3 = vpop.permute.xlu1 %229 }
 0x498   : > { %v220_v60 = vadd.f32 %v219_v57, %v212_v58 }
 0x49a   : > { %v228_v61 = vadd.f32 %v227_v59, %v220_v60 }
 0x49c   : > { %v231_v62 = vmul.f32 %v228_v61, %v228_v61  ;;  %v233_v63 = vmul.f32 0.5, %v228_v61 }
 0x49e   : > { %v234_v0 = vadd.f32 1.0, %v233_v63  ;;  %v232_v2 = vmul.f32 0.083333336, %v231_v62 }
 0x4a0   : > { %v236_v4 = vsub.f32 1.0, %v232_v2  ;;  %v235_v5 = vadd.f32 %v234_v0, %v232_v2 }
 0x4a2   : > { %v240_v6 = vmul.f32 %v236_v4, %v230_v3  ;;  %v238_v7 = vsel %vm73_vm0, 0.0, %v235_v5  ;;  %v239_v8 = vmul.f32 %v552_v41, %v235_v5 }
 0x4a3   : > { %244 = vrot.lane.b32.xlu1 %v238_v7, %s576_s8 }
 0x4a4   : > { %v241_v9 = vsub.f32 %v239_v8, %v240_v6 }
 0x4a6   : > { %v242_v10 = vsel %vm73_vm0, 1.0, %v241_v9 }
 0x4a7   : > { %247 = vrot.lane.b32.xlu0 %v242_v10, %s576_s8 }
 0x515   : > { %v245_v11 = vpop.permute.xlu1 %244 }
 0x516   : > { %v246_v12 = vsel %vm79_vm1, %v245_v11, 1.0 }
 0x517   : > { %v252_v13 = vmul.f32 %v246_v12, %v238_v7 }
 0x519   : > { %254 = vrot.lane.b32.xlu1 %v252_v13, %s577_s2  ;;  %v248_v14 = vpop.permute.xlu0 %247 }
 0x51a   : > { %v249_v15 = vsel %vm79_vm1, %v248_v14, 0.0 }
 0x51b   : > { %v250_v16 = vmul.f32 %v249_v15, %v238_v7 }
 0x51d   : > { %v251_v17 = vadd.f32 %v250_v16, %v242_v10 }
 0x51f   : > { %257 = vrot.lane.b32.xlu0 %v251_v17, %s577_s2 }
 0x58b   : > { %v255_v22 = vpop.permute.xlu1 %254 }
 0x58c   : > { %v256_v23 = vsel %vm89_vm2, %v255_v22, 1.0 }
 0x58d   : > { %v262_v24 = vmul.f32 %v256_v23, %v252_v13 }
 0x591   : > { %v258_v18 = vpop.permute.xlu0 %257 }
 0x592   : > { %v259_v19 = vsel %vm89_vm2, %v258_v18, 0.0 }
 0x593   : > { %v260_v20 = vmul.f32 %v259_v19, %v252_v13 }
 0x595   : > { %v261_v21 = vadd.f32 %v260_v20, %v251_v17 }
 0x597   : > { %264 = vrot.lane.b32.xlu0 %v261_v21, %s578_s17 }
 0x609   : > { %v265_v25 = vpop.permute.xlu0 %264  ;;  %192 = sbr.rel (!%p190_p2) target bundleno = 1036 (0x40c), region = 107 }
 0x60a   : > { %v266_v26 = vsel %vm99_vm3, %v265_v25, 0.0 }
 0x60b   : > { %v267_v27 = vmul.f32 %v266_v26, %v262_v24 }
 0x60d   : > { %v268_v28 = vadd.f32 %v267_v27, %v261_v21  }
 0x60f   : > { %v806_v41 = vmov %v268_v28  ;;  %269 = vst [vmem:[#allocation6] sm:$0xff] (%p190_p2), %v268_v28 }
 0x610   :  { %451 = shalt.err (!%p448_p7)
}
 0x611   :  { %s452_s25 = scalar_lea.hbm %s802_s5, 128 }
 0x612   :  { %p453_p8 = scmp.ne.s32.totalorder %s802_s5, %s452_s25  ;;  %p456_p9 = scmp.lt.u32.totalorder %s452_s25, %s802_s5 }
 0x614   :  { %p458_p10 = pnand %p456_p9, %p453_p8 }
 0x616   :  { %461 = shalt.err (!%p458_p10)
}
 0x617   :  { %289 = dma.vmem_to_hbm [thread:$0]  %s287_s19, 128, %s802_s5, [#allocation5]  }
 0x618   :  { %s462_s30 = scalar_lea.vmem %s277_s21, 128  ;;  %p467_p12 = scmp.lt.s32.totalorder %s277_s21, %s277_s21 }
 0x619   :  { %p463_p11 = scmp.ne.s32.totalorder %s277_s21, %s462_s30  ;;  %p468_p13 = scmp.lt.s32.totalorder %s462_s30, %s462_s30 }
 0x61b   :  { %p469_p0 = por %p468_p13, %p467_p12 }
 0x61d   :  { %p470_p1 = pnand %p469_p0, %p463_p11 }
 0x61f   :  { %473 = shalt.err (!%p470_p1)
}
 0x620   :  { %s474_s8 = scalar_lea.hbm %s801_s4, 128 }
 0x621   :  { %p475_p2 = scmp.ne.s32.totalorder %s801_s4, %s474_s8  ;;  %p478_p3 = scmp.lt.u32.totalorder %s474_s8, %s801_s4 }
 0x623   :  { %p480_p4 = pnand %p478_p3, %p475_p2 }
 0x625   :  { %483 = shalt.err (!%p480_p4)
}
 0x626   :  { %279 = dma.vmem_to_hbm [thread:$0]  %s277_s21, 128, %s801_s4, [#allocation3]  }
 0x627   :  { %s581_s14 = smov [#allocation6]  }
 0x628   :  { %s296_s15 = sshll.u32 %s581_s14, 4  ;;  %s297_s15 = int_to_ptr.vmem [resolvable:$true] %s296_s15 }
 0x629   :  { %s484_s16 = scalar_lea.vmem %s297_s15, 128  ;;  %p489_p6 = scmp.lt.s32.totalorder %s297_s15, %s297_s15 }
 0x62a   :  { %p485_p5 = scmp.ne.s32.totalorder %s297_s15, %s484_s16  ;;  %p490_p7 = scmp.lt.s32.totalorder %s484_s16, %s484_s16 }
 0x62c   :  { %p491_p8 = por %p490_p7, %p489_p6 }
 0x62e   :  { %p492_p9 = pnand %p491_p8, %p485_p5 }
 0x630   :  { %495 = shalt.err (!%p492_p9)
}
 0x631   :  { %s496_s18 = scalar_lea.hbm %s803_s6, 128 }
 0x632   :  { %p497_p10 = scmp.ne.s32.totalorder %s803_s6, %s496_s18  ;;  %p500_p11 = scmp.lt.u32.totalorder %s496_s18, %s803_s6 }
 0x634   :  { %p502_p12 = pnand %p500_p11, %p497_p10 }
 0x636   :  { %505 = shalt.err (!%p502_p12)
}
 0x637   :  { %299 = dma.vmem_to_hbm [thread:$0]  %s297_s15, 128, %s803_s6, [#allocation5]  }
 0x638   :  { %530 = dma.done.wait [#allocation3], 128  }
 0x639   :  { %531 = vsyncadd [#allocation3], 4294967168 }
 0x63a   :  { %532 = dma.done.wait [#allocation5], 256  }
 0x63b   :  { %533 = vsyncadd [#allocation5], 4294967040 }
 0x63c   :  { %309 = vsyncpa [#allocation3], 1 }
 0x63d   :  { %310 = vsyncpa [#allocation5], 1 }

</bundles_post_ra>
